<compile_context>
chip_gen: v5e
topology: v5e:2x2
jax: 0.10.0
libtpu: 0.0.40
codegen_flags: <defaults>
</compile_context>

<pallas_src>
import jax
import jax.numpy as jnp
from jax.experimental import pallas as pl
from jax.experimental.pallas import tpu as pltpu

# Chunk only when there is enough data to benefit from multiple in-flight
# DMA descriptors; a single descriptor already saturates HBM for small copies.
_CHUNK_THRESHOLD_BYTES = 4 * 1024 * 1024
_MAX_CHUNKS = 4


def _make_dma_copy_kernel(lead_dim: int, n_chunks: int):
    """Build a kernel that DMAs the whole (HBM-resident) input ref to the
    output ref, optionally split into `n_chunks` slices along axis 0."""

    def kernel(x_hbm, o_hbm, sems):
        if n_chunks <= 1:
            cp = pltpu.make_async_copy(x_hbm, o_hbm, sems.at[0])
            cp.start()
            cp.wait()
            return

        base = lead_dim // n_chunks
        rem = lead_dim % n_chunks
        copies = []
        start = 0
        # Static chunk boundaries (trace-time Python loop): each chunk gets
        # its own semaphore so all descriptors are in flight simultaneously.
        for i in range(n_chunks):
            size = base + (1 if i < rem else 0)
            cp = pltpu.make_async_copy(
                x_hbm.at[pl.ds(start, size)],
                o_hbm.at[pl.ds(start, size)],
                sems.at[i],
            )
            cp.start()
            copies.append(cp)
            start += size
        for cp in copies:
            cp.wait()

    return kernel


def _pass_copy(x: jax.Array) -> jax.Array:
    """Bit-exact materializing copy via direct HBM->HBM DMA."""
    itemsize = jnp.dtype(x.dtype).itemsize
    total_bytes = x.size * itemsize

    lead_dim = x.shape[0] if x.ndim >= 1 else 1
    if total_bytes >= _CHUNK_THRESHOLD_BYTES and x.ndim >= 1:
        n_chunks = min(_MAX_CHUNKS, lead_dim)
    else:
        n_chunks = 1

    kernel = _make_dma_copy_kernel(lead_dim, n_chunks)

    return pl.pallas_call(
        kernel,
        out_shape=jax.ShapeDtypeStruct(x.shape, x.dtype),
        in_specs=[pl.BlockSpec(memory_space=pl.ANY)],
        out_specs=pl.BlockSpec(memory_space=pl.ANY),
        scratch_shapes=[pltpu.SemaphoreType.DMA((max(n_chunks, 1),))],
        cost_estimate=pl.CostEstimate(
            flops=0,
            transcendentals=0,
            bytes_accessed=2 * total_bytes,
        ),
    )(x)


def pass_forward(x: jax.Array, materialize: bool = False) -> jax.Array:
    """Equivalent of Pass().forward(x).

    Default path is the true identity (returns x, zero HBM traffic).
    With materialize=True, a Pallas HBM->HBM DMA produces a fresh buffer.
    """
    if not materialize:
        return x
    if x.size == 0 or x.ndim == 0:
        # Nothing to DMA / scalar: identity is already exact.
        return x
    return _pass_copy(x)


if __name__ == "__main__":
    key = jax.random.PRNGKey(0)
    # NCHW example input, consistent with typical conv-style usage of the layer.
    x = jax.random.normal(key, (2, 4, 16, 16), dtype=jnp.float32)

    y = pass_forward(x)                         # identity fast path (no kernel)
    y_copy = pass_forward(x, materialize=True)  # exercises the Pallas DMA kernel
    jax.block_until_ready((y, y_copy))

    assert y.shape == x.shape and y.dtype == x.dtype
    assert y_copy.shape == x.shape and y_copy.dtype == x.dtype
    assert bool(jnp.all(y == x))
    assert bool(jnp.all(y_copy == x))

    print("KERNEL_OK")
</pallas_src>

<mosaic_0001>
module attributes {stable_mosaic.version = 11 : i64} {
  func.func @kernel(%arg0: memref<2x4x16x16xf32, #tpu.memory_space<any>>, %arg1: memref<2x4x16x16xf32, #tpu.memory_space<any>>, %arg2: memref<1x!tpu.dma_semaphore, #tpu.memory_space<semaphore_mem>>) attributes {dimension_semantics = [], scalar_prefetch = 0 : i64, scratch_operands = 1 : i64, tpu.core_type = #tpu.core_type<tc>} {
    %c0_i32 = arith.constant 0 : i32
    %0 = tpu.memref_slice %arg2[%c0_i32] : memref<1x!tpu.dma_semaphore, #tpu.memory_space<semaphore_mem>> -> memref<1x!tpu.dma_semaphore, #tpu.memory_space<semaphore_mem>>
    %1 = tpu.memref_squeeze %0 : memref<1x!tpu.dma_semaphore, #tpu.memory_space<semaphore_mem>> -> memref<!tpu.dma_semaphore, #tpu.memory_space<semaphore_mem>>
    tpu.enqueue_dma source(%arg0 : memref<2x4x16x16xf32, #tpu.memory_space<any>>) target(%arg1 : memref<2x4x16x16xf32, #tpu.memory_space<any>>) target_semaphore(%1 : memref<!tpu.dma_semaphore, #tpu.memory_space<semaphore_mem>>)
    %c0_i32_0 = arith.constant 0 : i32
    %2 = tpu.memref_slice %arg2[%c0_i32_0] : memref<1x!tpu.dma_semaphore, #tpu.memory_space<semaphore_mem>> -> memref<1x!tpu.dma_semaphore, #tpu.memory_space<semaphore_mem>>
    %3 = tpu.memref_squeeze %2 : memref<1x!tpu.dma_semaphore, #tpu.memory_space<semaphore_mem>> -> memref<!tpu.dma_semaphore, #tpu.memory_space<semaphore_mem>>
    tpu.wait_dma2 semaphore(%3 : memref<!tpu.dma_semaphore, #tpu.memory_space<semaphore_mem>>) src(%arg0 : memref<2x4x16x16xf32, #tpu.memory_space<any>>) dst(%arg1 : memref<2x4x16x16xf32, #tpu.memory_space<any>>)
    return
  }
}

</mosaic_0001>

<bundles_post_ra>
// kernel: tpu_custom_call.1
= control target key start
LH: loop header
LB: loop body
LE: loop exit
PB: predicated region body
PF: predicated region fallthrough
CT: control target
= control target key end

     0   :  { %s34_s12 = smov [#allocation2]   ;;  %s35_s13 = smov [#allocation3]   ;;  %s53_s0 = inlined_call_operand.hbm [shape: f32[2,4,16,16], index: 0, kind: input, shape index: {}]   ;;  %s54_s1 = inlined_call_operand.hbm [shape: f32[2,4,16,16], index: 1, kind: output, shape index: {}]  }
   0x1   :  { %s10_s8 = sshll.u32 %s53_s0, 4  ;;  %s12_s11 = sshll.u32 %s54_s1, 4  ;;  %s11_s8 = int_to_ptr.hbm [resolvable:$true] %s10_s8  ;;  %s13_s11 = int_to_ptr.hbm [resolvable:$true] %s12_s11 }
   0x2   :  { %s36_s14 = smov 0  }
   0x3   :  { %16 = dma.general %s11_s8, 2048, %s13_s11, %s34_s12, %s35_s13, [#allocation4], %s36_s14, 0  }
   0x4   :  { %32 = dma.done.wait [#allocation2], 2048 }
   0x5   :  { %33 = vsyncadd [#allocation2], 4294965248 }
   0x6   :  { %22 = vsyncmov [#allocation2] }
   0x9   :  { %s23_s15 = vpop.sfrf %22 }
   0xa   :  { %p28_p0 = scmp.ne.s32.totalorder %s23_s15, 0 }
   0xc   :  { %27 = shalt.err (%p28_p0)  }

</bundles_post_ra>
